<compile_context>
chip_gen: v6e
topology: v6e:2x2x1
jax: 0.10.0
libtpu: 0.0.40
codegen_flags: <defaults>
</compile_context>

<pallas_src>
from functools import partial

import jax
import jax.numpy as jnp
from jax.experimental import pallas as pl
from jax.experimental.pallas import tpu as pltpu

EPS = 1e-5  # torch.nn.LayerNorm default eps


def _erf(x):
    # Abramowitz & Stegun 7.1.26 rational approximation (max abs err ~1.5e-7).
    # Exact division (not pl.reciprocal(approx=True)) to hold the f32 tolerance.
    a1, a2, a3, a4, a5 = 0.254829592, -0.284496736, 1.421413741, -1.453152027, 1.061405429
    p = 0.3275911
    s = jnp.sign(x)
    ax = jnp.abs(x)
    t = 1.0 / (1.0 + p * ax)
    poly = ((((a5 * t + a4) * t + a3) * t + a2) * t + a1) * t
    return s * (1.0 - poly * jnp.exp(-ax * ax))


def _layernorm(x, w, b):
    # matches LayerNorm.forward: compute in float32, eps=1e-5, affine
    xf = x.astype(jnp.float32)
    mu = jnp.mean(xf, axis=-1, keepdims=True)
    var = jnp.mean((xf - mu) ** 2, axis=-1, keepdims=True)
    return (xf - mu) * jax.lax.rsqrt(var + EPS) * w + b


# ---------------------------------------------------------------------------
# Kernel A: x1 = x + attn(attn_ln(x))        grid = (B, Tp // tq)
# ---------------------------------------------------------------------------
def _attn_kernel(x_q_ref, x_full_ref,
                 ln_w, ln_b, wq, bq, wk, wv_w, bv, wo, bo,
                 o_ref, k_scr, v_scr, q_scr, ctx_scr, *, n_head):
    cdt = k_scr.dtype                       # matmul compute dtype
    n_kv, dh = k_scr.shape[1], k_scr.shape[2]
    tq = x_q_ref.shape[1]
    D = n_head * dh

    # ---- K/V for this batch element: computed once per batch (qt == 0) ----
    @pl.when(pl.program_id(1) == 0)
    def _():
        hf = _layernorm(x_full_ref[0], ln_w[0], ln_b[0]).astype(cdt)      # (T, D)
        # wk is pre-scaled by dh**-0.25 in the wrapper; key has no bias.
        k = jnp.dot(hf, wk[...], preferred_element_type=jnp.float32)
        v = jnp.dot(hf, wv_w[...], preferred_element_type=jnp.float32) + bv[0]
        # head-major layout so the per-head loop only indexes the leading axis
        k_scr[...] = k.reshape(n_kv, n_head, dh).transpose(1, 0, 2).astype(cdt)
        v_scr[...] = v.reshape(n_kv, n_head, dh).transpose(1, 0, 2).astype(cdt)

    # ---- queries for this q-tile (wq/bq pre-scaled by dh**-0.25) ----------
    xq = x_q_ref[0]                                                       # (tq, D)
    hq = _layernorm(xq, ln_w[0], ln_b[0]).astype(cdt)
    q = jnp.dot(hq, wq[...], preferred_element_type=jnp.float32) + bq[0]
    q_scr[...] = q.reshape(tq, n_head, dh).transpose(1, 0, 2).astype(cdt)

    # ---- per-head attention: fori_loop bounds live ranges to one head -----
    def head_body(hd, carry):
        qh = q_scr[hd]                                                    # (tq, dh)
        kh = k_scr[hd]                                                    # (T, dh)
        s = jax.lax.dot_general(qh, kh, (((1,), (1,)), ((), ())),
                                preferred_element_type=jnp.float32)       # (tq, T)
        s = s - jnp.max(s, axis=-1, keepdims=True)
        e = jnp.exp(s)
        p = e / jnp.sum(e, axis=-1, keepdims=True)                        # exact
        ctx_scr[hd] = jnp.dot(p.astype(cdt), v_scr[hd],
                              preferred_element_type=jnp.float32).astype(cdt)
        return carry

    jax.lax.fori_loop(0, n_head, head_body, 0)

    # one full-width (tq, D) @ (D, D) output projection
    ctx = ctx_scr[...].transpose(1, 0, 2).reshape(tq, D)
    attn = jnp.dot(ctx, wo[...], preferred_element_type=jnp.float32) + bo[0]
    o_ref[0] = (xq.astype(jnp.float32) + attn).astype(o_ref.dtype)


# ---------------------------------------------------------------------------
# Kernel B: out = x1 + mlp(mlp_ln(x1))       grid = (B, Tp // tq)
# ---------------------------------------------------------------------------
def _mlp_kernel(x_ref, ln_w, ln_b, w1, b1, w2, b2, o_ref):
    x = x_ref[0]                                                          # (tq, D)
    cdt = w1.dtype
    h = _layernorm(x, ln_w[0], ln_b[0]).astype(cdt)
    u = jnp.dot(h, w1[...], preferred_element_type=jnp.float32) + b1[0]   # (tq, 4D)
    g = u * 0.5 * (1.0 + _erf(u * 0.7071067811865476))                    # exact GELU
    m = jnp.dot(g.astype(cdt), w2[...], preferred_element_type=jnp.float32) + b2[0]
    o_ref[0] = (x.astype(jnp.float32) + m).astype(o_ref.dtype)


# ---------------------------------------------------------------------------
# Wrapper
# ---------------------------------------------------------------------------
def _round_up(x, m):
    return ((x + m - 1) // m) * m


def _tpu_vmem_capacity():
    # generation-aware budget: v5e/v6e = 128 MiB, v7x = 64 MiB per TensorCore
    try:
        return int(pltpu.get_tpu_info().vmem_capacity_bytes)
    except Exception:
        return 64 << 20          # conservative fallback (v7x per-core VMEM)


def _vmem_limit_bytes(weight_arrays, activation_bytes, capacity):
    weight_bytes = sum(int(a.size) * a.dtype.itemsize for a in weight_arrays)
    # inputs are double-buffered by default; activation_bytes is already in bytes
    est = 2 * weight_bytes + int(activation_bytes) + (4 << 20)
    return int(min(max(est, 16 << 20), (capacity * 7) // 8))


def _pick_row_tile(T, capacity):
    cap = 256 if capacity <= (64 << 20) else 512
    return min(cap, _round_up(T, 8))


def residual_attention_block(x, params, n_head, compute_dtype=None):
    """x: (B, T, D). params: dict of f32 weights (see _init_params).

    compute_dtype: dtype fed to the MXU (default x.dtype, matching torch
    Linear's weight.to(x.dtype)).  Pass jnp.bfloat16 for f32 inputs when a
    2-4x MXU throughput win is worth ~1e-3-class error (all elementwise math
    stays in f32)."""
    B, T, D = x.shape
    assert D % n_head == 0
    dh = D // n_head
    scale = float(dh) ** (-0.25)
    cdt = jnp.dtype(compute_dtype) if compute_dtype is not None else jnp.dtype(x.dtype)
    capacity = _tpu_vmem_capacity()

    f32 = lambda a: jnp.asarray(a, jnp.float32)
    asw = lambda a: jnp.asarray(a, jnp.float32).astype(cdt)

    # q/k scale (dh**-0.25) folded into the projection weights
    attn_ln_w, attn_ln_b = f32(params["attn_ln_w"]), f32(params["attn_ln_b"])
    wq = asw(f32(params["wq"]) * scale)
    bq = f32(params["bq"]) * scale
    wk = asw(f32(params["wk"]) * scale)          # key: bias=False
    wv = asw(params["wv"]); bv = f32(params["bv"])
    wo = asw(params["wo"]); bo = f32(params["bo"])
    mlp_ln_w, mlp_ln_b = f32(params["mlp_ln_w"]), f32(params["mlp_ln_b"])
    w1 = asw(params["w1"]); b1 = f32(params["b1"])
    w2 = asw(params["w2"]); b2 = f32(params["b2"])

    cb = jnp.dtype(cdt).itemsize
    xb = jnp.dtype(x.dtype).itemsize

    # shared row tile for both kernels; pad T so the tile divides evenly.
    tq = _pick_row_tile(T, capacity)
    Tp = _round_up(T, tq)
    x_pad = x if Tp == T else jnp.pad(x, ((0, 0), (0, Tp - T), (0, 0)))
    n_qt = Tp // tq

    # ---- stage 1: x1 = x + attn(attn_ln(x)) -------------------------------
    attn_weights = (attn_ln_w, attn_ln_b, wq, bq, wk, wv, bv, wo, bo)

    def const_spec_a(a):
        nd = a.ndim
        return pl.BlockSpec(a.shape, lambda b, t, _nd=nd: (0,) * _nd)

    act_a = (T * D * (xb + 3 * 4)          # resident x_full + LN/K/V f32 transients
             + 2 * T * D * cb              # K/V head-major scratch
             + 2 * tq * D * cb             # Q / context head-major scratch
             + 4 * tq * D * (xb + 4)       # double-buffered x_q/out tiles + f32 temps
             + 3 * tq * Tp * 4)            # one head's score/exp/prob temporaries

    x1 = pl.pallas_call(
        partial(_attn_kernel, n_head=n_head),
        out_shape=jax.ShapeDtypeStruct((B, Tp, D), x.dtype),
        grid=(B, n_qt),
        in_specs=[pl.BlockSpec((1, tq, D), lambda b, t: (b, t, 0)),   # q-tile rows
                  pl.BlockSpec((1, T, D), lambda b, t: (b, 0, 0))]    # full (unpadded) seq for K/V
                 + [const_spec_a(a) for a in attn_weights],
        out_specs=pl.BlockSpec((1, tq, D), lambda b, t: (b, t, 0)),
        scratch_shapes=[pltpu.VMEM((n_head, T, dh), cdt),    # K (head-major)
                        pltpu.VMEM((n_head, T, dh), cdt),    # V
                        pltpu.VMEM((n_head, tq, dh), cdt),   # Q for this tile
                        pltpu.VMEM((n_head, tq, dh), cdt)],  # per-head context
        compiler_params=pltpu.CompilerParams(
            # qt axis must stay "arbitrary": the K/V scratch filled at qt==0 is
            # reused by the later q tiles of the same batch element.
            dimension_semantics=("parallel", "arbitrary"),
            vmem_limit_bytes=_vmem_limit_bytes(attn_weights, act_a, capacity)),
    )(x_pad, x, *attn_weights)

    # ---- stage 2: out = x1 + mlp(mlp_ln(x1)) ------------------------------
    mlp_weights = (mlp_ln_w, mlp_ln_b, w1, b1, w2, b2)

    def const_spec_m(a):
        nd = a.ndim
        return pl.BlockSpec(a.shape, lambda b, t, _nd=nd: (0,) * _nd)

    act_m = (4 * tq * D * (xb + 4)      # double-buffered x/out tiles + f32 temps
             + 3 * tq * 4 * D * 4)      # (tq, 4D) f32 GELU intermediates

    out = pl.pallas_call(
        _mlp_kernel,
        out_shape=jax.ShapeDtypeStruct((B, Tp, D), x.dtype),
        grid=(B, n_qt),
        in_specs=[pl.BlockSpec((1, tq, D), lambda b, t: (b, t, 0))]
                 + [const_spec_m(a) for a in mlp_weights],
        out_specs=pl.BlockSpec((1, tq, D), lambda b, t: (b, t, 0)),
        compiler_params=pltpu.CompilerParams(
            dimension_semantics=("parallel", "parallel"),
            vmem_limit_bytes=_vmem_limit_bytes(mlp_weights, act_m, capacity)),
    )(x1, *mlp_weights)

    return out if Tp == T else out[:, :T, :]


# ---------------------------------------------------------------------------
# Pure-JAX reference (mirrors the PyTorch forward) for a correctness check.
# ---------------------------------------------------------------------------
def _ref_block(x, p, n_head):
    def ln(y, w, b):
        mu = y.mean(-1, keepdims=True)
        var = ((y - mu) ** 2).mean(-1, keepdims=True)
        return (y - mu) / jnp.sqrt(var + EPS) * w + b

    B, T, D = x.shape
    dh = D // n_head
    scale = dh ** (-0.25)

    h = ln(x, p["attn_ln_w"], p["attn_ln_b"])
    q = h @ p["wq"] + p["bq"]
    k = h @ p["wk"]
    v = h @ p["wv"] + p["bv"]
    q = q.reshape(B, T, n_head, dh).transpose(0, 2, 1, 3) * scale
    k = k.reshape(B, T, n_head, dh).transpose(0, 2, 3, 1) * scale
    v = v.reshape(B, T, n_head, dh).transpose(0, 2, 1, 3)
    qk = q @ k
    w = jax.nn.softmax(qk, axis=-1)
    wv = (w @ v).transpose(0, 2, 1, 3).reshape(B, T, D)
    x = x + wv @ p["wo"] + p["bo"]

    h2 = ln(x, p["mlp_ln_w"], p["mlp_ln_b"])
    u = h2 @ p["w1"] + p["b1"]
    g = jax.nn.gelu(u, approximate=False)
    return x + g @ p["w2"] + p["b2"]


def _init_params(key, n_state):
    n_mlp = 4 * n_state
    ks = jax.random.split(key, 16)
    nrm = lambda k, shape, s=0.02: (s * jax.random.normal(k, shape)).astype(jnp.float32)
    return {
        "attn_ln_w": 1.0 + nrm(ks[0], (1, n_state), 0.1),
        "attn_ln_b": nrm(ks[1], (1, n_state), 0.1),
        "wq": nrm(ks[2], (n_state, n_state)),
        "bq": nrm(ks[3], (1, n_state)),
        "wk": nrm(ks[4], (n_state, n_state)),          # key: bias=False
        "wv": nrm(ks[5], (n_state, n_state)),
        "bv": nrm(ks[6], (1, n_state)),
        "wo": nrm(ks[7], (n_state, n_state)),
        "bo": nrm(ks[8], (1, n_state)),
        "mlp_ln_w": 1.0 + nrm(ks[9], (1, n_state), 0.1),
        "mlp_ln_b": nrm(ks[10], (1, n_state), 0.1),
        "w1": nrm(ks[11], (n_state, n_mlp)),
        "b1": nrm(ks[12], (1, n_mlp)),
        "w2": nrm(ks[13], (n_mlp, n_state)),
        "b2": nrm(ks[14], (1, n_state)),
    }


if __name__ == "__main__":
    # TODO(synk): cross-attention / gated x-attn / kv_cache / mask branches are
    # not exercised (module defaults: cross_attention=False, add_gated_x_attn=0).
    B, T, D, H = 2, 8, 32, 4

    key = jax.random.PRNGKey(0)
    kx, kp = jax.random.split(key)
    x = (0.5 * jax.random.normal(kx, (B, T, D))).astype(jnp.float32)
    params = _init_params(kp, D)

    # float32 path (module semantics for f32 inputs)
    out = jax.block_until_ready(residual_attention_block(x, params, H))
    ref = jax.block_until_ready(_ref_block(x, params, H))
    assert out.shape == (B, T, D) and out.dtype == jnp.float32
    err = float(jnp.max(jnp.abs(out - ref)))
    assert jnp.allclose(out, ref, atol=2e-4, rtol=2e-4), err

    # odd sequence length exercises the row-tile padding path
    kx2, _ = jax.random.split(kx)
    x_odd = (0.5 * jax.random.normal(kx2, (B, 12, D))).astype(jnp.float32)
    out_odd = jax.block_until_ready(residual_attention_block(x_odd, params, H))
    ref_odd = _ref_block(x_odd, params, H)
    assert out_odd.shape == (B, 12, D)
    err_odd = float(jnp.max(jnp.abs(out_odd - ref_odd)))
    assert jnp.allclose(out_odd, ref_odd, atol=2e-4, rtol=2e-4), err_odd

    # bf16 MXU path (bf16 weights + bf16 matmul inputs, f32 accumulation)
    x_bf = x.astype(jnp.bfloat16)
    out_bf = jax.block_until_ready(
        residual_attention_block(x_bf, params, H, compute_dtype=jnp.bfloat16))
    ref_bf = _ref_block(x_bf.astype(jnp.float32), params, H)
    assert out_bf.dtype == jnp.bfloat16
    err_bf = float(jnp.max(jnp.abs(out_bf.astype(jnp.float32) - ref_bf)))
    assert jnp.allclose(out_bf.astype(jnp.float32), ref_bf, atol=5e-2, rtol=5e-2), err_bf

    print("KERNEL_OK")
</pallas_src>

<mosaic_0001>
module attributes {stable_mosaic.version = 11 : i64} {
  func.func @_attn_kernel(%arg0: i32, %arg1: i32, %arg2: memref<1x8x32xf32, #tpu.memory_space<vmem>>, %arg3: memref<1x8x32xf32, #tpu.memory_space<vmem>>, %arg4: memref<1x32xf32, #tpu.memory_space<vmem>>, %arg5: memref<1x32xf32, #tpu.memory_space<vmem>>, %arg6: memref<32x32xf32, #tpu.memory_space<vmem>>, %arg7: memref<1x32xf32, #tpu.memory_space<vmem>>, %arg8: memref<32x32xf32, #tpu.memory_space<vmem>>, %arg9: memref<32x32xf32, #tpu.memory_space<vmem>>, %arg10: memref<1x32xf32, #tpu.memory_space<vmem>>, %arg11: memref<32x32xf32, #tpu.memory_space<vmem>>, %arg12: memref<1x32xf32, #tpu.memory_space<vmem>>, %arg13: memref<1x8x32xf32, #tpu.memory_space<vmem>>, %arg14: memref<4x8x8xf32, #tpu.memory_space<vmem>>, %arg15: memref<4x8x8xf32, #tpu.memory_space<vmem>>, %arg16: memref<4x8x8xf32, #tpu.memory_space<vmem>>, %arg17: memref<4x8x8xf32, #tpu.memory_space<vmem>>) attributes {dimension_semantics = [#tpu.dimension_semantics<parallel>, #tpu.dimension_semantics<arbitrary>], iteration_bounds = array<i64: 2, 1>, scalar_prefetch = 0 : i64, scratch_operands = 4 : i64, tpu.core_type = #tpu.core_type<tc>, window_params = [{transform_indices = @transform_0, window_bounds = array<i64: 1, 8, 32>}, {transform_indices = @transform_1, window_bounds = array<i64: 1, 8, 32>}, {pipeline_mode = #tpu.pipeline_mode<synchronous>, transform_indices = @transform_2, window_bounds = array<i64: 1, 32>}, {pipeline_mode = #tpu.pipeline_mode<synchronous>, transform_indices = @transform_3, window_bounds = array<i64: 1, 32>}, {pipeline_mode = #tpu.pipeline_mode<synchronous>, transform_indices = @transform_4, window_bounds = array<i64: 32, 32>}, {pipeline_mode = #tpu.pipeline_mode<synchronous>, transform_indices = @transform_5, window_bounds = array<i64: 1, 32>}, {pipeline_mode = #tpu.pipeline_mode<synchronous>, transform_indices = @transform_6, window_bounds = array<i64: 32, 32>}, {pipeline_mode = #tpu.pipeline_mode<synchronous>, transform_indices = @transform_7, window_bounds = array<i64: 32, 32>}, {pipeline_mode = #tpu.pipeline_mode<synchronous>, transform_indices = @transform_8, window_bounds = array<i64: 1, 32>}, {pipeline_mode = #tpu.pipeline_mode<synchronous>, transform_indices = @transform_9, window_bounds = array<i64: 32, 32>}, {pipeline_mode = #tpu.pipeline_mode<synchronous>, transform_indices = @transform_10, window_bounds = array<i64: 1, 32>}, {transform_indices = @transform_11, window_bounds = array<i64: 1, 8, 32>}]} {
    %c0_i32 = arith.constant 0 : i32
    %0 = arith.cmpi eq, %arg1, %c0_i32 : i32
    %1 = arith.extui %0 : i1 to i32
    %c0_i32_0 = arith.constant 0 : i32
    %2 = arith.cmpi ne, %1, %c0_i32_0 : i32
    scf.if %2 {
      %c0_32 = arith.constant 0 : index
      %c0_33 = arith.constant 0 : index
      %c0_34 = arith.constant 0 : index
      %58 = vector.load %arg3[%c0_32, %c0_33, %c0_34] : memref<1x8x32xf32, #tpu.memory_space<vmem>>, vector<1x8x32xf32>
      %59 = vector.shape_cast %58 : vector<1x8x32xf32> to vector<8x32xf32>
      %c0_35 = arith.constant 0 : index
      %c0_36 = arith.constant 0 : index
      %60 = vector.load %arg4[%c0_35, %c0_36] : memref<1x32xf32, #tpu.memory_space<vmem>>, vector<1x32xf32>
      %61 = vector.shape_cast %60 : vector<1x32xf32> to vector<32xf32>
      %c0_37 = arith.constant 0 : index
      %c0_38 = arith.constant 0 : index
      %62 = vector.load %arg5[%c0_37, %c0_38] : memref<1x32xf32, #tpu.memory_space<vmem>>, vector<1x32xf32>
      %63 = vector.shape_cast %62 : vector<1x32xf32> to vector<32xf32>
      %cst_39 = arith.constant dense<0.000000e+00> : vector<8xf32>
      %64 = vector.multi_reduction <add>, %59, %cst_39 [1] : vector<8x32xf32> to vector<8xf32>
      %65 = vector.shape_cast %64 : vector<8xf32> to vector<8x1xf32>
      %cst_40 = arith.constant 3.200000e+01 : f32
      %66 = vector.broadcast %cst_40 : f32 to vector<8x1xf32>
      %67 = arith.divf %65, %66 : vector<8x1xf32>
      %68 = vector.broadcast %67 : vector<8x1xf32> to vector<8x32xf32>
      %69 = arith.subf %59, %68 : vector<8x32xf32>
      %70 = arith.mulf %69, %69 : vector<8x32xf32>
      %cst_41 = arith.constant dense<0.000000e+00> : vector<8xf32>
      %71 = vector.multi_reduction <add>, %70, %cst_41 [1] : vector<8x32xf32> to vector<8xf32>
      %72 = vector.shape_cast %71 : vector<8xf32> to vector<8x1xf32>
      %cst_42 = arith.constant 3.200000e+01 : f32
      %73 = vector.broadcast %cst_42 : f32 to vector<8x1xf32>
      %74 = arith.divf %72, %73 : vector<8x1xf32>
      %75 = vector.broadcast %67 : vector<8x1xf32> to vector<8x32xf32>
      %76 = arith.subf %59, %75 : vector<8x32xf32>
      %cst_43 = arith.constant 9.99999974E-6 : f32
      %77 = vector.broadcast %cst_43 : f32 to vector<8x1xf32>
      %78 = arith.addf %74, %77 : vector<8x1xf32>
      %79 = math.rsqrt %78 : vector<8x1xf32>
      %80 = vector.broadcast %79 : vector<8x1xf32> to vector<8x32xf32>
      %81 = arith.mulf %76, %80 : vector<8x32xf32>
      %82 = vector.shape_cast %61 : vector<32xf32> to vector<1x32xf32>
      %83 = vector.broadcast %82 : vector<1x32xf32> to vector<8x32xf32>
      %84 = arith.mulf %81, %83 : vector<8x32xf32>
      %85 = vector.shape_cast %63 : vector<32xf32> to vector<1x32xf32>
      %86 = vector.broadcast %85 : vector<1x32xf32> to vector<8x32xf32>
      %87 = arith.addf %84, %86 : vector<8x32xf32>
      %c0_44 = arith.constant 0 : index
      %c0_45 = arith.constant 0 : index
      %88 = vector.load %arg8[%c0_44, %c0_45] : memref<32x32xf32, #tpu.memory_space<vmem>>, vector<32x32xf32>
      %cst_46 = arith.constant dense<0.000000e+00> : vector<8x32xf32>
      %89 = tpu.matmul %87, %88, %cst_46 {dimension_numbers = #tpu.dot_dimension_numbers<[1], [0], [0], [1], [0, 0, 1, 1], [], []>} : vector<8x32xf32>, vector<32x32xf32>, vector<8x32xf32> -> vector<8x32xf32>
      %c0_47 = arith.constant 0 : index
      %c0_48 = arith.constant 0 : index
      %90 = vector.load %arg9[%c0_47, %c0_48] : memref<32x32xf32, #tpu.memory_space<vmem>>, vector<32x32xf32>
      %cst_49 = arith.constant dense<0.000000e+00> : vector<8x32xf32>
      %91 = tpu.matmul %87, %90, %cst_49 {dimension_numbers = #tpu.dot_dimension_numbers<[1], [0], [0], [1], [0, 0, 1, 1], [], []>} : vector<8x32xf32>, vector<32x32xf32>, vector<8x32xf32> -> vector<8x32xf32>
      %c0_50 = arith.constant 0 : index
      %c0_51 = arith.constant 0 : index
      %92 = vector.load %arg10[%c0_50, %c0_51] : memref<1x32xf32, #tpu.memory_space<vmem>>, vector<1x32xf32>
      %93 = vector.shape_cast %92 : vector<1x32xf32> to vector<32xf32>
      %94 = vector.shape_cast %93 : vector<32xf32> to vector<1x32xf32>
      %95 = vector.broadcast %94 : vector<1x32xf32> to vector<8x32xf32>
      %96 = arith.addf %91, %95 : vector<8x32xf32>
      %97 = vector.shape_cast %89 : vector<8x32xf32> to vector<8x4x8xf32>
      %98 = tpu.transpose %97, [1, 0, 2] : vector<8x4x8xf32> -> vector<4x8x8xf32>
      %c0_52 = arith.constant 0 : index
      %c0_53 = arith.constant 0 : index
      %c0_54 = arith.constant 0 : index
      %99 = vector.load %arg14[%c0_52, %c0_53, %c0_54] : memref<4x8x8xf32, #tpu.memory_space<vmem>>, vector<4x8x8xf32>
      tpu.vector_store %arg14[%c0_52, %c0_53, %c0_54], %98 {strides = array<i32>} : memref<4x8x8xf32, #tpu.memory_space<vmem>>, vector<4x8x8xf32>,
      %100 = vector.shape_cast %96 : vector<8x32xf32> to vector<8x4x8xf32>
      %101 = tpu.transpose %100, [1, 0, 2] : vector<8x4x8xf32> -> vector<4x8x8xf32>
      %c0_55 = arith.constant 0 : index
      %c0_56 = arith.constant 0 : index
      %c0_57 = arith.constant 0 : index
      %102 = vector.load %arg15[%c0_55, %c0_56, %c0_57] : memref<4x8x8xf32, #tpu.memory_space<vmem>>, vector<4x8x8xf32>
      tpu.vector_store %arg15[%c0_55, %c0_56, %c0_57], %101 {strides = array<i32>} : memref<4x8x8xf32, #tpu.memory_space<vmem>>, vector<4x8x8xf32>,
    } else {
    }
    %c0 = arith.constant 0 : index
    %c0_1 = arith.constant 0 : index
    %c0_2 = arith.constant 0 : index
    %3 = vector.load %arg2[%c0, %c0_1, %c0_2] : memref<1x8x32xf32, #tpu.memory_space<vmem>>, vector<1x8x32xf32>
    %4 = vector.shape_cast %3 : vector<1x8x32xf32> to vector<8x32xf32>
    %c0_3 = arith.constant 0 : index
    %c0_4 = arith.constant 0 : index
    %5 = vector.load %arg4[%c0_3, %c0_4] : memref<1x32xf32, #tpu.memory_space<vmem>>, vector<1x32xf32>
    %6 = vector.shape_cast %5 : vector<1x32xf32> to vector<32xf32>
    %c0_5 = arith.constant 0 : index
    %c0_6 = arith.constant 0 : index
    %7 = vector.load %arg5[%c0_5, %c0_6] : memref<1x32xf32, #tpu.memory_space<vmem>>, vector<1x32xf32>
    %8 = vector.shape_cast %7 : vector<1x32xf32> to vector<32xf32>
    %cst = arith.constant dense<0.000000e+00> : vector<8xf32>
    %9 = vector.multi_reduction <add>, %4, %cst [1] : vector<8x32xf32> to vector<8xf32>
    %10 = vector.shape_cast %9 : vector<8xf32> to vector<8x1xf32>
    %cst_7 = arith.constant 3.200000e+01 : f32
    %11 = vector.broadcast %cst_7 : f32 to vector<8x1xf32>
    %12 = arith.divf %10, %11 : vector<8x1xf32>
    %13 = vector.broadcast %12 : vector<8x1xf32> to vector<8x32xf32>
    %14 = arith.subf %4, %13 : vector<8x32xf32>
    %15 = arith.mulf %14, %14 : vector<8x32xf32>
    %cst_8 = arith.constant dense<0.000000e+00> : vector<8xf32>
    %16 = vector.multi_reduction <add>, %15, %cst_8 [1] : vector<8x32xf32> to vector<8xf32>
    %17 = vector.shape_cast %16 : vector<8xf32> to vector<8x1xf32>
    %cst_9 = arith.constant 3.200000e+01 : f32
    %18 = vector.broadcast %cst_9 : f32 to vector<8x1xf32>
    %19 = arith.divf %17, %18 : vector<8x1xf32>
    %20 = vector.broadcast %12 : vector<8x1xf32> to vector<8x32xf32>
    %21 = arith.subf %4, %20 : vector<8x32xf32>
    %cst_10 = arith.constant 9.99999974E-6 : f32
    %22 = vector.broadcast %cst_10 : f32 to vector<8x1xf32>
    %23 = arith.addf %19, %22 : vector<8x1xf32>
    %24 = math.rsqrt %23 : vector<8x1xf32>
    %25 = vector.broadcast %24 : vector<8x1xf32> to vector<8x32xf32>
    %26 = arith.mulf %21, %25 : vector<8x32xf32>
    %27 = vector.shape_cast %6 : vector<32xf32> to vector<1x32xf32>
    %28 = vector.broadcast %27 : vector<1x32xf32> to vector<8x32xf32>
    %29 = arith.mulf %26, %28 : vector<8x32xf32>
    %30 = vector.shape_cast %8 : vector<32xf32> to vector<1x32xf32>
    %31 = vector.broadcast %30 : vector<1x32xf32> to vector<8x32xf32>
    %32 = arith.addf %29, %31 : vector<8x32xf32>
    %c0_11 = arith.constant 0 : index
    %c0_12 = arith.constant 0 : index
    %33 = vector.load %arg6[%c0_11, %c0_12] : memref<32x32xf32, #tpu.memory_space<vmem>>, vector<32x32xf32>
    %cst_13 = arith.constant dense<0.000000e+00> : vector<8x32xf32>
    %34 = tpu.matmul %32, %33, %cst_13 {dimension_numbers = #tpu.dot_dimension_numbers<[1], [0], [0], [1], [0, 0, 1, 1], [], []>} : vector<8x32xf32>, vector<32x32xf32>, vector<8x32xf32> -> vector<8x32xf32>
    %c0_14 = arith.constant 0 : index
    %c0_15 = arith.constant 0 : index
    %35 = vector.load %arg7[%c0_14, %c0_15] : memref<1x32xf32, #tpu.memory_space<vmem>>, vector<1x32xf32>
    %36 = vector.shape_cast %35 : vector<1x32xf32> to vector<32xf32>
    %37 = vector.shape_cast %36 : vector<32xf32> to vector<1x32xf32>
    %38 = vector.broadcast %37 : vector<1x32xf32> to vector<8x32xf32>
    %39 = arith.addf %34, %38 : vector<8x32xf32>
    %40 = vector.shape_cast %39 : vector<8x32xf32> to vector<8x4x8xf32>
    %41 = tpu.transpose %40, [1, 0, 2] : vector<8x4x8xf32> -> vector<4x8x8xf32>
    %c0_16 = arith.constant 0 : index
    %c0_17 = arith.constant 0 : index
    %c0_18 = arith.constant 0 : index
    %42 = vector.load %arg16[%c0_16, %c0_17, %c0_18] : memref<4x8x8xf32, #tpu.memory_space<vmem>>, vector<4x8x8xf32>
    tpu.vector_store %arg16[%c0_16, %c0_17, %c0_18], %41 {strides = array<i32>} : memref<4x8x8xf32, #tpu.memory_space<vmem>>, vector<4x8x8xf32>,
    %c0_i32_19 = arith.constant 0 : i32
    %c4_i32 = arith.constant 4 : i32
    %43 = arith.addi %c0_i32_19, %c4_i32 : i32
    %c1_i32 = arith.constant 1 : i32
    scf.for %arg18 = %c0_i32_19 to %43 step %c1_i32  : i32 {
      %58 = arith.index_cast %arg18 : i32 to index
      %c0_32 = arith.constant 0 : index
      %c0_33 = arith.constant 0 : index
      %59 = vector.load %arg16[%58, %c0_32, %c0_33] : memref<4x8x8xf32, #tpu.memory_space<vmem>>, vector<1x8x8xf32>
      %60 = vector.shape_cast %59 : vector<1x8x8xf32> to vector<8x8xf32>
      %61 = arith.index_cast %arg18 : i32 to index
      %c0_34 = arith.constant 0 : index
      %c0_35 = arith.constant 0 : index
      %62 = vector.load %arg14[%61, %c0_34, %c0_35] : memref<4x8x8xf32, #tpu.memory_space<vmem>>, vector<1x8x8xf32>
      %63 = vector.shape_cast %62 : vector<1x8x8xf32> to vector<8x8xf32>
      %cst_36 = arith.constant dense<0.000000e+00> : vector<8x8xf32>
      %64 = tpu.matmul %60, %63, %cst_36 {dimension_numbers = #tpu.dot_dimension_numbers<[1], [1], [0], [0], [0, 0, 1, 0], [], []>} : vector<8x8xf32>, vector<8x8xf32>, vector<8x8xf32> -> vector<8x8xf32>
      %cst_37 = arith.constant dense<0xFF800000> : vector<8xf32>
      %65 = vector.multi_reduction <maximumf>, %64, %cst_37 [1] : vector<8x8xf32> to vector<8xf32>
      %66 = vector.shape_cast %65 : vector<8xf32> to vector<8x1xf32>
      %67 = vector.broadcast %66 : vector<8x1xf32> to vector<8x8xf32>
      %68 = arith.subf %64, %67 : vector<8x8xf32>
      %69 = math.exp %68 : vector<8x8xf32>
      %cst_38 = arith.constant dense<0.000000e+00> : vector<8xf32>
      %70 = vector.multi_reduction <add>, %69, %cst_38 [1] : vector<8x8xf32> to vector<8xf32>
      %71 = vector.shape_cast %70 : vector<8xf32> to vector<8x1xf32>
      %72 = vector.broadcast %71 : vector<8x1xf32> to vector<8x8xf32>
      %73 = arith.divf %69, %72 : vector<8x8xf32>
      %74 = arith.index_cast %arg18 : i32 to index
      %c0_39 = arith.constant 0 : index
      %c0_40 = arith.constant 0 : index
      %75 = vector.load %arg15[%74, %c0_39, %c0_40] : memref<4x8x8xf32, #tpu.memory_space<vmem>>, vector<1x8x8xf32>
      %76 = vector.shape_cast %75 : vector<1x8x8xf32> to vector<8x8xf32>
      %cst_41 = arith.constant dense<0.000000e+00> : vector<8x8xf32>
      %77 = tpu.matmul %73, %76, %cst_41 {dimension_numbers = #tpu.dot_dimension_numbers<[1], [0], [0], [1], [0, 0, 1, 1], [], []>} : vector<8x8xf32>, vector<8x8xf32>, vector<8x8xf32> -> vector<8x8xf32>
      %78 = arith.index_cast %arg18 : i32 to index
      %c0_42 = arith.constant 0 : index
      %c0_43 = arith.constant 0 : index
      %79 = vector.load %arg17[%78, %c0_42, %c0_43] : memref<4x8x8xf32, #tpu.memory_space<vmem>>, vector<1x8x8xf32>
      %80 = vector.shape_cast %79 : vector<1x8x8xf32> to vector<8x8xf32>
      %81 = vector.shape_cast %77 : vector<8x8xf32> to vector<1x8x8xf32>
      tpu.vector_store %arg17[%78, %c0_42, %c0_43], %81 {strides = array<i32>} : memref<4x8x8xf32, #tpu.memory_space<vmem>>, vector<1x8x8xf32>,
    }
    %c4_i32_20 = arith.constant 4 : i32
    %c0_21 = arith.constant 0 : index
    %c0_22 = arith.constant 0 : index
    %c0_23 = arith.constant 0 : index
    %44 = vector.load %arg17[%c0_21, %c0_22, %c0_23] : memref<4x8x8xf32, #tpu.memory_space<vmem>>, vector<4x8x8xf32>
    %45 = tpu.transpose %44, [1, 0, 2] : vector<4x8x8xf32> -> vector<8x4x8xf32>
    %46 = vector.shape_cast %45 : vector<8x4x8xf32> to vector<8x32xf32>
    %c0_24 = arith.constant 0 : index
    %c0_25 = arith.constant 0 : index
    %47 = vector.load %arg11[%c0_24, %c0_25] : memref<32x32xf32, #tpu.memory_space<vmem>>, vector<32x32xf32>
    %cst_26 = arith.constant dense<0.000000e+00> : vector<8x32xf32>
    %48 = tpu.matmul %46, %47, %cst_26 {dimension_numbers = #tpu.dot_dimension_numbers<[1], [0], [0], [1], [0, 0, 1, 1], [], []>} : vector<8x32xf32>, vector<32x32xf32>, vector<8x32xf32> -> vector<8x32xf32>
    %c0_27 = arith.constant 0 : index
    %c0_28 = arith.constant 0 : index
    %49 = vector.load %arg12[%c0_27, %c0_28] : memref<1x32xf32, #tpu.memory_space<vmem>>, vector<1x32xf32>
    %50 = vector.shape_cast %49 : vector<1x32xf32> to vector<32xf32>
    %51 = vector.shape_cast %50 : vector<32xf32> to vector<1x32xf32>
    %52 = vector.broadcast %51 : vector<1x32xf32> to vector<8x32xf32>
    %53 = arith.addf %48, %52 : vector<8x32xf32>
    %54 = arith.addf %4, %53 : vector<8x32xf32>
    %c0_29 = arith.constant 0 : index
    %c0_30 = arith.constant 0 : index
    %c0_31 = arith.constant 0 : index
    %55 = vector.load %arg13[%c0_29, %c0_30, %c0_31] : memref<1x8x32xf32, #tpu.memory_space<vmem>>, vector<1x8x32xf32>
    %56 = vector.shape_cast %55 : vector<1x8x32xf32> to vector<8x32xf32>
    %57 = vector.shape_cast %54 : vector<8x32xf32> to vector<1x8x32xf32>
    tpu.vector_store %arg13[%c0_29, %c0_30, %c0_31], %57 {strides = array<i32>} : memref<1x8x32xf32, #tpu.memory_space<vmem>>, vector<1x8x32xf32>,
    return
  }
  func.func @transform_0(%arg0: i32, %arg1: i32) -> (i32, i32, i32) {
    %c0_i32 = arith.constant 0 : i32
    %c0_i32_0 = arith.constant 0 : i32
    return %arg0, %arg1, %c0_i32 : i32, i32, i32
  }
  func.func @transform_1(%arg0: i32, %arg1: i32) -> (i32, i32, i32) {
    %c0_i32 = arith.constant 0 : i32
    %c0_i32_0 = arith.constant 0 : i32
    %c0_i32_1 = arith.constant 0 : i32
    return %arg0, %c0_i32, %c0_i32_0 : i32, i32, i32
  }
  func.func @transform_2(%arg0: i32, %arg1: i32) -> (i32, i32) {
    %c0_i32 = arith.constant 0 : i32
    %c0_i32_0 = arith.constant 0 : i32
    %c0_i32_1 = arith.constant 0 : i32
    return %c0_i32, %c0_i32_0 : i32, i32
  }
  func.func @transform_3(%arg0: i32, %arg1: i32) -> (i32, i32) {
    %c0_i32 = arith.constant 0 : i32
    %c0_i32_0 = arith.constant 0 : i32
    %c0_i32_1 = arith.constant 0 : i32
    return %c0_i32, %c0_i32_0 : i32, i32
  }
  func.func @transform_4(%arg0: i32, %arg1: i32) -> (i32, i32) {
    %c0_i32 = arith.constant 0 : i32
    %c0_i32_0 = arith.constant 0 : i32
    %c0_i32_1 = arith.constant 0 : i32
    return %c0_i32, %c0_i32_0 : i32, i32
  }
  func.func @transform_5(%arg0: i32, %arg1: i32) -> (i32, i32) {
    %c0_i32 = arith.constant 0 : i32
    %c0_i32_0 = arith.constant 0 : i32
    %c0_i32_1 = arith.constant 0 : i32
    return %c0_i32, %c0_i32_0 : i32, i32
  }
  func.func @transform_6(%arg0: i32, %arg1: i32) -> (i32, i32) {
    %c0_i32 = arith.constant 0 : i32
    %c0_i32_0 = arith.constant 0 : i32
    %c0_i32_1 = arith.constant 0 : i32
    return %c0_i32, %c0_i32_0 : i32, i32
  }
  func.func @transform_7(%arg0: i32, %arg1: i32) -> (i32, i32) {
    %c0_i32 = arith.constant 0 : i32
    %c0_i32_0 = arith.constant 0 : i32
    %c0_i32_1 = arith.constant 0 : i32
    return %c0_i32, %c0_i32_0 : i32, i32
  }
  func.func @transform_8(%arg0: i32, %arg1: i32) -> (i32, i32) {
    %c0_i32 = arith.constant 0 : i32
    %c0_i32_0 = arith.constant 0 : i32
    %c0_i32_1 = arith.constant 0 : i32
    return %c0_i32, %c0_i32_0 : i32, i32
  }
  func.func @transform_9(%arg0: i32, %arg1: i32) -> (i32, i32) {
    %c0_i32 = arith.constant 0 : i32
    %c0_i32_0 = arith.constant 0 : i32
    %c0_i32_1 = arith.constant 0 : i32
    return %c0_i32, %c0_i32_0 : i32, i32
  }
  func.func @transform_10(%arg0: i32, %arg1: i32) -> (i32, i32) {
    %c0_i32 = arith.constant 0 : i32
    %c0_i32_0 = arith.constant 0 : i32
    %c0_i32_1 = arith.constant 0 : i32
    return %c0_i32, %c0_i32_0 : i32, i32
  }
  func.func @transform_11(%arg0: i32, %arg1: i32) -> (i32, i32, i32) {
    %c0_i32 = arith.constant 0 : i32
    %c0_i32_0 = arith.constant 0 : i32
    return %arg0, %arg1, %c0_i32 : i32, i32, i32
  }
}

</mosaic_0001>

<bundles_post_ra>
// kernel: tpu_custom_call.1
= control target key start
LH: loop header
LB: loop body
LE: loop exit
PB: predicated region body
PF: predicated region fallthrough
CT: control target
= control target key end

     0   :  { %s2878_s0 = inlined_call_operand.hbm [shape: f32[2,8,32], index: 0, kind: input, shape index: {}]   ;;  %s2879_s1 = inlined_call_operand.hbm [shape: f32[2,8,32], index: 1, kind: input, shape index: {}]   ;;  %s2880_s2 = inlined_call_operand.vmem [shape: f32[1,32], index: 2, kind: input, shape index: {}]   ;;  %s2881_s3 = inlined_call_operand.vmem [shape: f32[1,32], index: 3, kind: input, shape index: {}]   ;;  %s2882_s4 = inlined_call_operand.hbm [shape: f32[32,32], index: 4, kind: input, shape index: {}]   ;;  %s2883_s5 = inlined_call_operand.vmem [shape: f32[1,32], index: 5, kind: input, shape index: {}]   ;;  %s2884_s6 = inlined_call_operand.hbm [shape: f32[32,32], index: 6, kind: input, shape index: {}]   ;;  %s2885_s7 = inlined_call_operand.hbm [shape: f32[32,32], index: 7, kind: input, shape index: {}]   ;;  %s2886_s8 = inlined_call_operand.vmem [shape: f32[1,32], index: 8, kind: input, shape index: {}]   ;;  %s2887_s9 = inlined_call_operand.hbm [shape: f32[32,32], index: 9, kind: input, shape index: {}]   ;;  %s2888_s10 = inlined_call_operand.vmem [shape: f32[1,32], index: 10, kind: input, shape index: {}]   ;;  %s2889_s11 = inlined_call_operand.hbm [shape: f32[2,8,32], index: 11, kind: output, shape index: {}]  }
   0x1   :  { %2894 = sst [smem:[#allocation28_spill]] %s2878_s0 }
   0x2   :  { %2895 = sst [smem:[#allocation29_spill]] %s2882_s4 }
   0x3   :  { %2896 = sst [smem:[#allocation30_spill]] %s2884_s6 }
   0x4   :  { %2897 = sst [smem:[#allocation31_spill]] %s2885_s7 }
   0x5   :  { %2898 = sst [smem:[#allocation32_spill]] %s2887_s9 }
   0x6   :  { %16 = vsyncpa [#allocation7], 0 }
   0x7   :  { %18 = vsyncpa [#allocation7 + $0x1], 0 }
   0x8   :  { %19 = vsyncpa [#allocation10], 0 }
   0x9   :  { %21 = vsyncpa [#allocation10 + $0x1], 0 }
   0xa   :  { %22 = vsyncpa [#allocation13], 0 }
   0xb   :  { %23 = vsyncpa [#allocation16], 0 }
   0xc   :  { %24 = vsyncpa [#allocation8], 0 }
   0xd   :  { %26 = vsyncpa [#allocation8 + $0x1], 0  ;;  %s2479_s17 = smov 0   ;;  %s2481_s18 = smov 0  }
   0xe   :  { %s2483_s19 = smov 0   ;;  %s2485_s20 = smov 0  }
   0xf   :  { %s2487_s21 = smov 0   ;;  %s2489_s22 = smov 0  }
  0x10 LB: > { %2899 = sst [smem:[#allocation24_spill]] %s2372_s17  ;;  %s2510_s23 = sadd.s32 4294967295, %s2392_s22   ;;  %s2392_s22 = sphi %s2489_s22, %s32_s22   ;;  %s2388_s21 = sphi %s2487_s21, %s2925_s21   ;;  %s2384_s20 = sphi %s2485_s20, %s2924_s20   ;;  %s2380_s19 = sphi %s2483_s19, %s2928_s19   ;;  %s2376_s18 = sphi %s2481_s18, %s2927_s18   ;;  %s2372_s17 = sphi %s2479_s17, %s2926_s17  }
  0x11   : > { %2900 = sst [smem:[#allocation25_spill]] %s2388_s21  ;;  %p1865_p0 = scmp.ge.s32.totalorder %s2392_s22, 1 }
  0x12   : > { %p2893_p1 = scmp.eq.s32.totalorder %s2510_s23, 0  ;;  %p320_p2 = scmp.lt.s32.totalorder %s2392_s22, 3 }
  0x13   : > { %s2398_s25 = smov [#allocation11]   ;;  %s2399_s28 = smov [#allocation12]  }
  0x14   : > { %p2515_p3 = pnand %p1865_p0, %p320_p2  ;;  %s338_s26 = sshll.u32 %s2398_s25, 4  ;;  %s339_s26 = int_to_ptr.vmem [resolvable:$true] %s338_s26 }
  0x15   : > { %s354_s29 = sshll.u32 %s2399_s28, 4  ;;  %s2400_s30 = smov [#allocation14]   ;;  %s355_s29 = int_to_ptr.vmem [resolvable:$true] %s354_s29 }
  0x16   : > { %p2010_p4 = pneg %p2515_p3  ;;  %s367_s12 = sshll.u32 %s2400_s30, 4  ;;  %s368_s12 = int_to_ptr.vmem [resolvable:$true] %s367_s12 }
  0x17   : > { %s2143_s13 = scalar_lea.vmem %s339_s26, 512  ;;  %p2151_p11 = scmp.lt.s32.totalorder %s339_s26, %s339_s26 }
  0x18   : > { %p2524_p6 = pnand %p2010_p4, %p2893_p1  ;;  %p2144_p8 = scmp.ne.s32.totalorder %s339_s26, %s2143_s13 }
  0x19   : > { %p2152_p12 = scmp.lt.s32.totalorder %s2143_s13, %s2143_s13 }
  0x1a   : > { %p2134_p7 = pneg %p2524_p6 }
  0x1b   : > { %p2153_p13 = por %p2152_p12, %p2151_p11 }
  0x1c   : > { %p2146_p9 = pnand %p2144_p8, %p2134_p7 }
  0x1e   : > { %p2147_p10 = pneg %p2146_p9 }
  0x20   : > { %p2154_p0 = pnand %p2153_p13, %p2147_p10 }
  0x22   : > { %2157 = shalt.err (!%p2154_p0)
}
  0x23   : > { %s2401_s14 = smov 128   ;;  %s2402_s15 = smov 8  }
  0x24   : > { %s2903_s4 = sld [smem:[#allocation29_spill]]  ;;  %s2169_s28 = scalar_lea.vmem %s355_s29, 512 }
  0x25   : > { %p2170_p2 = scmp.ne.s32.totalorder %s355_s29, %s2169_s28  ;;  %p2177_p9 = scmp.lt.s32.totalorder %s355_s29, %s355_s29 }
  0x26   : > { %p2178_p10 = scmp.lt.s32.totalorder %s2169_s28, %s2169_s28 }
  0x27   : > { %p2172_p4 = pnand %p2170_p2, %p2134_p7 }
  0x28   : > { %p2179_p11 = por %p2178_p10, %p2177_p9 }
  0x29   : > { %p2173_p8 = pneg %p2172_p4 }
  0x2a   : > { %2013 = dma.hbm_to_vmem [thread:$0]  (!%p2524_p6), %s2903_s4, 512, %s339_s26, [#allocation10], %s2401_s14, %s2401_s14, %s2402_s15  }
  0x2b   : > { %p2180_p12 = pnand %p2179_p11, %p2173_p8 }
  0x2d   : > { %2183 = shalt.err (!%p2180_p12)
}
  0x2e   : > { %s2904_s6 = sld [smem:[#allocation30_spill]]  ;;  %s2195_s26 = scalar_lea.vmem %s368_s12, 512 }
  0x2f   : > { %p2196_p13 = scmp.ne.s32.totalorder %s368_s12, %s2195_s26  ;;  %p2203_p4 = scmp.lt.s32.totalorder %s368_s12, %s368_s12 }
  0x30   : > { %p2204_p8 = scmp.lt.s32.totalorder %s2195_s26, %s2195_s26 }
  0x31   : > { %p2198_p0 = pnand %p2196_p13, %p2134_p7 }
  0x32   : > { %p2205_p9 = por %p2204_p8, %p2203_p4 }
  0x33   : > { %p2199_p2 = pneg %p2198_p0 }
  0x34   : > { %2016 = dma.hbm_to_vmem [thread:$0]  (!%p2524_p6), %s2904_s6, 512, %s355_s29, [#allocation13], %s2401_s14, %s2401_s14, %s2402_s15  }
  0x35   : > { %p2206_p10 = pnand %p2205_p9, %p2199_p2 }
  0x37   : > { %2209 = shalt.err (!%p2206_p10)
}
  0x38   : > { %s2905_s7 = sld [smem:[#allocation31_spill]]  ;;  %s2403_s29 = smov [#allocation15]  }
  0x39   : > { %s383_s28 = sshll.u32 %s2403_s29, 4  ;;  %s384_s28 = int_to_ptr.vmem [resolvable:$true] %s383_s28 }
  0x3a   : > { %s2221_s30 = scalar_lea.vmem %s384_s28, 512  ;;  %p2229_p0 = scmp.lt.s32.totalorder %s384_s28, %s384_s28 }
  0x3b   : > { %p2222_p11 = scmp.ne.s32.totalorder %s384_s28, %s2221_s30  ;;  %p2230_p2 = scmp.lt.s32.totalorder %s2221_s30, %s2221_s30 }
  0x3d   : > { %p2224_p12 = pnand %p2222_p11, %p2134_p7  ;;  %p2231_p4 = por %p2230_p2, %p2229_p0 }
  0x3e   : > { %2019 = dma.hbm_to_vmem [thread:$0]  (!%p2524_p6), %s2905_s7, 512, %s368_s12, [#allocation13], %s2401_s14, %s2401_s14, %s2402_s15  }
  0x3f   : > { %p2225_p13 = pneg %p2224_p12 }
  0x41   : > { %p2232_p8 = pnand %p2231_p4, %p2225_p13 }
  0x43   : > { %2235 = shalt.err (!%p2232_p8)
}
  0x44   : > { %s2906_s9 = sld [smem:[#allocation32_spill]]  ;;  %s1864_s27 = sadd.s32 4294967294, %s2392_s22  }
  0x45   : > { %s44_s26 = sadd.s32 1, %s2388_s21  ;;  %s53_s16 = sadd.s32 1, %s2380_s19 }
  0x46   : > { %p46_p7 = scmp.ge.s32.totalorder %s44_s26, 2  ;;  %p60_p9 = scmp.ne.s32.totalorder %s2380_s19, %s2376_s18 }
  0x47   : > { %p61_p10 = scmp.eq.s32.totalorder %s2392_s22, 0  ;;  %p66_p12 = scmp.ne.s32.totalorder %s2376_s18, %s2372_s17 }
  0x48   : > { %s2930_s26 = smov (%p46_p7, %s44_s26), 0  ;;  %p313_p4 = scmp.eq.s32.totalorder %s1864_s27, 1 }
  0x49   : > { %2907 = sst [smem:[#allocation26_spill]] %s2930_s26  ;;  %p2582_p11 = por %p61_p10, %p60_p9 }
  0x4a   : > { %2022 = dma.hbm_to_vmem [thread:$0]  (!%p2524_p6), %s2906_s9, 512, %s384_s28, [#allocation16], %s2401_s14, %s2401_s14, %s2402_s15  }
  0x4b   : > { %s48_s14 = ssub.s32 %s2388_s21, %s2930_s26  ;;  %p307_p6 = scmp.eq.s32.totalorder %s2510_s23, 1 }
  0x4c   : > { %p51_p13 = scmp.eq.s32.totalorder %s48_s14, 0  ;;  %p2593_p0 = por %p2893_p1, %p66_p12 }
  0x4d   : > { %p2597_p2 = por %p307_p6, %p60_p9  ;;  %p2604_p8 = por %p313_p4, %p66_p12 }
  0x4e   : > { %s2602_s28 = scalar_select %p51_p13, %s2380_s19, %s53_s16  }
  0x4f   : > { %p2038_p7 = scmp.lt.s32.totalorder %s2392_s22, 2  ;;  %s400_s12 = sand.u32 1, %s2380_s19  }
  0x50   : > { %2911 = sst [smem:[#allocation27_spill]] %s2602_s28  ;;  %s1872_s13 = sshll.u32 %s2388_s21, 7 }
  0x51   : > { %s1871_s14 = sshll.u32 %s400_s12, 3  ;;  %s2913_s0 = sld [smem:[#allocation28_spill]] }
  0x52   : > { %s404_s9 = scalar_lea.vmem [#allocation6], %s1871_s14  ;;  %p2616_p9 = pnand %p2038_p7, %p2582_p11 }
  0x53   : > { %s412_s26 = sshll.u32 %s404_s9, 4  ;;  %s2623_s28 = scalar_lea.hbm %s2879_s1, %s1872_s13  ;;  %s413_s26 = int_to_ptr.vmem [resolvable:$true] %s412_s26 }
  0x54   : > { %s401_s21 = scalar_lea.sflag [#allocation7], %s400_s12  ;;  %p2238_p10 = pneg %p2616_p9 }
  0x55   : > { %s2249_s4 = scalar_lea.vmem %s413_s26, 128  ;;  %s2404_s6 = smov [#allocation6]  }
  0x56   : > { %p2250_p12 = scmp.ne.s32.totalorder %s413_s26, %s2249_s4  ;;  %s2254_s9 = sshll.u32 %s2404_s6, 4  ;;  %s2255_s9 = int_to_ptr.vmem [resolvable:$false] %s2254_s9 }
  0x57   : > { %s410_s7 = scalar_lea.hbm %s2913_s0, %s1872_s13  ;;  %s2256_s25 = scalar_lea.vmem %s2255_s9, 256 }
  0x58   : > { %p2252_p6 = pnand %p2250_p12, %p2238_p10  ;;  %p2257_p13 = scmp.lt.s32.totalorder %s413_s26, %s2255_s9 }
  0x59   : > { %p2258_p4 = scmp.lt.s32.totalorder %s2256_s25, %s2249_s4 }
  0x5a   : > { %p2253_p11 = pneg %p2252_p6 }
  0x5b   : > { %p2259_p7 = por %p2258_p4, %p2257_p13 }
  0x5d   : > { %p2260_p5 = pnand %p2259_p7, %p2253_p11 }
  0x5f   : > { %2263 = shalt.err (!%p2260_p5)
}
  0x60   : > { %2026 = dma.hbm_to_vmem [thread:$0]  (!%p2616_p9), %s410_s7, 128, %s413_s26, %s401_s21  }
  0x61   : > { %s419_s12 = sand.u32 1, %s2392_s22   ;;  %s423_s13 = scalar_lea.vmem [#allocation9], %s1871_s14 }
  0x62   : > { %s430_s27 = sshll.u32 %s423_s13, 4  ;;  %s420_s16 = scalar_lea.sflag [#allocation10], %s419_s12  ;;  %s431_s27 = int_to_ptr.vmem [resolvable:$true] %s430_s27 }
  0x63   : > { %s2277_s0 = scalar_lea.vmem %s431_s27, 128  ;;  %s2405_s4 = smov [#allocation9]  }
  0x64   : > { %p2278_p12 = scmp.ne.s32.totalorder %s431_s27, %s2277_s0  ;;  %s2282_s6 = sshll.u32 %s2405_s4, 4  ;;  %s2283_s6 = int_to_ptr.vmem [resolvable:$false] %s2282_s6 }
  0x65   : > { %s2284_s9 = scalar_lea.vmem %s2283_s6, 256  ;;  %p2285_p5 = scmp.lt.s32.totalorder %s431_s27, %s2283_s6 }
  0x66   : > { %p2280_p6 = pnand %p2278_p12, %p2238_p10  ;;  %p2286_p11 = scmp.lt.s32.totalorder %s2284_s9, %s2277_s0 }
  0x68   : > { %p2281_p1 = pneg %p2280_p6  ;;  %p2287_p13 = por %p2286_p11, %p2285_p5 }
  0x6a   : > { %p2288_p4 = pnand %p2287_p13, %p2281_p1 }
  0x6c   : > { %2291 = shalt.err (!%p2288_p4)
}
  0x6d   : > { %2029 = dma.hbm_to_vmem [thread:$0]  (!%p2616_p9), %s2623_s28, 128, %s431_s27, %s420_s16  }
  0x6e   : > { %439 = sbr.rel (%p2515_p3) target bundleno = 1850 (0x73a), region = 64  ;;  %s2642_s7 = sand.u32 (!%p2515_p3), 1, %s2376_s18  }
  0x6f   : > { %s2645_s21 = sshll.u32 (!%p2515_p3), %s2642_s7, 3  ;;  %s442_s0 = scalar_lea.sflag (!%p2515_p3), [#allocation7], %s2642_s7 }
  0x70   : > { %s445_s26 = scalar_lea.vmem (!%p2515_p3), [#allocation6], %s2645_s21 }
  0x73   : > { %2347 = dma.done.wait (%p2593_p0), %s442_s0, 128  }
  0x74   : > { %2349 = vsyncadd (%p2593_p0), %s442_s0, 4294967168  ;;  %s450_s17 = sand.u32 1, %s2510_s23   ;;  %s454_s28 = scalar_lea.vmem [#allocation9], %s2645_s21 }
  0x75   : > { %s451_s24 = scalar_lea.sflag [#allocation10], %s450_s17 }
  0x76   : > { %2351 = dma.done.wait (%p2593_p0), %s451_s24, 128  }
  0x77   : > { %2353 = vsyncadd (%p2593_p0), %s451_s24, 4294967168  ;;  %p2915_p1 = scmp.eq.s32.totalorder %s2510_s23, 0 }
  0x79   : > { %2355 = dma.done.wait (%p2915_p1), [#allocation10], 512   ;;  %p2916_p3 = pmov %p2915_p1 }
  0x7a   : > { %p2917_p9 = pmov %p2915_p1 }
  0x7b   : > { %2357 = vsyncadd (%p2916_p3), [#allocation10], 4294966784 }
  0x7c   : > { %2359 = dma.done.wait (%p2917_p9), [#allocation13], 1024   ;;  %p2918_p10 = pmov %p2915_p1 }
  0x7d   : > { %p2919_p7 = pmov %p2915_p1 }
  0x7e   : > { %2361 = vsyncadd (%p2918_p10), [#allocation13], 4294966272 }
  0x7f   : > { %2363 = dma.done.wait (%p2919_p7), [#allocation16], 512   ;;  %p2920_p12 = pmov %p2915_p1 }
  0x80   : > { %vm521_vm0 = vcmask 261120   ;;  %v518_v0 = vld [vmem:[%s454_s28] sm:$0xff]  ;;  %v2671_v1 = vld [vmem:[%s445_s26] sm:$0xff]  ;;  %v2406_v14 = vmov 0.0   ;;  %vm2407_vm1 = vmmov 0   ;;  %s2408_s27 = smov 120   ;;  %v723_v55 = vlaneseq }
  0x81   : > { %2365 = vsyncadd (%p2920_p12), [#allocation16], 4294966784  ;;  %v522_v2 = vsel %vm521_vm0, %v518_v0, 0.0  ;;  %v1013_v3 = vsel %vm521_vm0, %v2671_v1, 0.0  ;;  %1934 = vmatprep.subr.mxu0 %v2406_v14  ;;  %v553_v15 = vld [vmem:[#allocation12 + $0x18] sm:$0xff]  ;;  %1945 = vmatprep.subr.mxu1 %v2406_v14  ;;  %v552_v17 = vld [vmem:[#allocation12 + $0x10] sm:$0xff] }
  0x82   : > { %523 = vadd.xlane.f32.xlu0 %v522_v2  ;;  %1935 = vmatpush3.msra.mxu0 %v553_v15  ;;  %v630_v16 = vld [vmem:[#allocation14 + $0x18] sm:$0xff]  ;;  %v629_v18 = vld [vmem:[#allocation14 + $0x10] sm:$0xff]  ;;  %v551_v19 = vld [vmem:[#allocation12 + $0x8] sm:$0xff]  ;;  %s2409_s16 = smov 112   ;;  %s2410_s4 = smov 104   ;;  %v724_v59 = vshrl.u32 %v723_v55, 7 }
  0x83   : > { %1936 = vmatprep.subr.mxu0 %v2406_v14  ;;  %1946 = vmatpush3.msra.mxu1 %v630_v16  ;;  %v628_v20 = vld [vmem:[#allocation14 + $0x8] sm:$0xff]  ;;  %v550_v21 = vld [vmem:[#allocation12] sm:$0xff]  ;;  %v1044_v37 = vld [vmem:[#allocation11 + $0x18] sm:$0xff]  ;;  %v2411_v53 = vmov 1983009808   ;;  %vm854_vm2 = vcmask 64512  }
  0x84   : > { %1937 = vmatpush3.msra.mxu0 %v552_v17  ;;  %1947 = vmatprep.subr.mxu1 %v2406_v14  ;;  %v627_v22 = vld [vmem:[#allocation14] sm:$0xff]  ;;  %v1043_v38 = vld [vmem:[#allocation11 + $0x10] sm:$0xff]  ;;  %v1042_v39 = vld [vmem:[#allocation11 + $0x8] sm:$0xff]  ;;  %v721_v54 = vunpack.c.l.s4 %v2411_v53  ;;  %v2412_v56 = vmov 1934713408   ;;  %s513_s0 = scalar_lea.vmem [#allocation17], %s2645_s21 }
  0x85   : > { %1938 = vmatprep.subr.mxu0 %v2406_v14  ;;  %1948 = vmatpush3.msra.mxu1 %v629_v18  ;;  %v1883_v30 = vld [vmem:[%s2880_s2] ss:$0 sm:$0xff]  ;;  %v753_v57 = vunpack.c.l.s4 %v2412_v56  ;;  %s2784_s26 = smov 0  }
  0x86   : > { %1014 = vadd.xlane.f32.xlu0 %v1013_v3  ;;  %1939 = vmatpush3.msra.mxu0 %v551_v19  ;;  %v1884_v32 = vld [vmem:[%s2881_s3] ss:$0 sm:$0xff]  ;;  %v722_v58 = vunpack.c.0.s8 %v721_v54 }
  0x87   : > { %1949 = vmatprep.subr.mxu1 %v2406_v14  ;;  %1940 = vmatprep.subr.mxu0 %v2406_v14  ;;  %v1041_v41 = vld [vmem:[#allocation11] sm:$0xff]  ;;  %v754_v62 = vunpack.c.0.s8 %v753_v57 }
  0x88   : > { %1950 = vmatpush3.msra.mxu1 %v628_v20  ;;  %1941 = vmatpush3.msra.mxu0 %v550_v21  ;;  %v1886_v44 = vld [vmem:[%s2886_s8] ss:$0 sm:$0xff]  ;;  %v2717_v63 = vsub.s32 %v722_v58, %v724_v59 }
  0x89   : > { %1951 = vmatprep.subr.mxu1 %v2406_v14  ;;  %1942 = vmatprep.mubr.msk.f32.mxu0 %vm2407_vm1, %v2406_v14  ;;  %v1894_v49 = vld [vmem:[%s2883_s5] ss:$0 sm:$0xff] }
  0x8a   : > { %1952 = vmatpush3.msra.mxu1 %v627_v22  ;;  %1953 = vmatprep.mubr.msk.f32.mxu1 %vm2407_vm1, %v2406_v14 }
  0x8b   : > { %1956 = vmatprep.subr.mxu0 %v2406_v14 }
 0x10b   : > { %v524_v4 = vpop.xlane.xlu0 %523 }
 0x10c   : > { %v526_v5 = vmul.f32 0.03125, %v524_v4 }
 0x10e   : > { %v527_v6 = vsub.f32 %v518_v0, %v526_v5 }
 0x10f   : > { %v1015_v7 = vpop.xlane.xlu0 %1014 }
 0x110   : > { %v1017_v8 = vmul.f32 0.03125, %v1015_v7  ;;  %v528_v9 = vmul.f32 %v527_v6, %v527_v6  ;;  %v2719_v7 = vsub.s32 %v754_v62, %v724_v59 }
 0x112   : > { %v1018_v10 = vsub.f32 %v2671_v1, %v1017_v8  ;;  %v529_v11 = vsel %vm521_vm0, %v528_v9, 0.0 }
 0x113   : > { %530 = vadd.xlane.f32.xlu1 %v529_v11 }
 0x114   : > { %v1019_v12 = vmul.f32 %v1018_v10, %v1018_v10 }
 0x116   : > { %v1020_v13 = vsel %vm521_vm0, %v1019_v12, 0.0 }
 0x117   : > { %1021 = vadd.xlane.f32.xlu1 %v1020_v13 }
 0x19c   : > { %v531_v23 = vpop.xlane.xlu1 %530 }
 0x19d   : > { %v532_v24 = vmul.f32 0.03125, %v531_v23 }
 0x19f   : > { %v533_v25 = vadd.f32 1e-05, %v532_v24 }
 0x1a0   : > { %v1022_v26 = vpop.xlane.xlu1 %1021 }
 0x1a1   : > { %2118 = vrsqrt.f32 %v533_v25  ;;  %v1023_v27 = vmul.f32 0.03125, %v1022_v26 }
 0x1a3   : > { %v1024_v28 = vadd.f32 1e-05, %v1023_v27 }
 0x1a5   : > { %2120 = vrsqrt.f32 %v1024_v28 }
 0x1ae   : > { %v2119_v29 = vpop.eup %2118 }
 0x1af   : > { %v535_v31 = vmul.f32 %v2119_v29, %v527_v6 }
 0x1b1   : > { %v542_v33 = vmul.f32 %v1883_v30, %v535_v31 }
 0x1b2   : > { %v2121_v34 = vpop.eup %2120 }
 0x1b3   : > { %v1026_v35 = vmul.f32 %v2121_v34, %v1018_v10  ;;  %v549_v36 = vadd.f32 %v1884_v32, %v542_v33 }
 0x1b5   : > { %1943 = vmatmul.mubr.msk.f32.vlgmr.msra.gmra.mxu0 %vm521_vm0, %v549_v36  ;;  %1954 = vmatmul.mubr.msk.f32.vlgmr.msra.gmra.mxu1 %vm521_vm0, %v549_v36  ;;  %v1033_v40 = vmul.f32 %v1883_v30, %v1026_v35 }
 0x1b6   : > { %1957 = vmatpush3.msra.mxu0 %v1044_v37  ;;  %1964 = vmatprep.mubr.msk.f32.mxu0 %vm2407_vm1, %v2406_v14 }
 0x1b7   : > { %1958 = vmatprep.subr.mxu0 %v2406_v14  ;;  %v1040_v42 = vadd.f32 %v1884_v32, %v1033_v40 }
 0x1b8   : > { %1959 = vmatpush3.msra.mxu0 %v1043_v38 }
 0x1b9   : > { %1960 = vmatprep.subr.mxu0 %v2406_v14 }
 0x1ba   : > { %1961 = vmatpush3.msra.mxu0 %v1042_v39 }
 0x1bb   : > { %1962 = vmatprep.subr.mxu0 %v2406_v14 }
 0x1bc   : > { %1963 = vmatpush3.msra.mxu0 %v1041_v41 }
 0x1bd   : > { %1965 = vmatmul.mubr.msk.f32.vlgmr.msra.gmra.mxu0 %vm521_vm0, %v1040_v42 }
 0x275   : > { %v623_v43 = vpop.f32.mrf.mxu0  ;;  %v704_v45 = vpop.f32.mrf.mxu1 }
 0x276   : > { %709 = vrot.lane.b32.xlu0 %v623_v43, %s2408_s27  ;;  %712 = vrot.lane.b32.xlu1 %v623_v43, %s2409_s16  ;;  %v705_v48 = vadd.f32 %v1886_v44, %v704_v45 }
 0x277   : > { %v1944_v46 = vpop.f32.mrf.mxu0  ;;  %v1955_v47 = vpop.f32.mrf.mxu1 }
 0x27a   : > { %863 = vrot.lane.b32.xlu0 %v705_v48, %s2409_s16  ;;  %715 = vrot.lane.b32.xlu1 %v623_v43, %s2410_s4 }
 0x27d   : > { %v1121_v50 = vpop.f32.mrf.mxu0 }
 0x27e   : > { %v2712_v51 = vadd.f32 %v1894_v49, %v1121_v50  ;;  %860 = vrot.lane.b32.xlu1 %v705_v48, %s2408_s27 }
 0x27f   : > { %v1966_v52 = vpop.f32.mrf.mxu0 }
 0x280   : > { %1126 = vrot.lane.b32.xlu0 %v2712_v51, %s2408_s27 }
 0x282   : > { %866 = vrot.lane.b32.xlu1 %v705_v48, %s2410_s4 }
 0x284   : > { %1132 = vrot.lane.b32.xlu0 %v2712_v51, %s2410_s4 }
 0x286   : > { %1129 = vrot.lane.b32.xlu1 %v2712_v51, %s2409_s16 }
 0x2e8   : > { %v713_v60 = vpop.permute.xlu1 %712  ;;  %v710_v61 = vpop.permute.xlu0 %709 }
 0x2e9   : > { %v718_v0 = vcombine.low %v623_v43, %v713_v60  ;;  %v719_v2 = vcombine.high %v623_v43, %v713_v60 }
 0x2eb   : > { %v726_v8 = vrot.slane %v718_v0, %v2717_v63  ;;  %v733_v9 = vrot.slane %v719_v2, %v2717_v63 }
 0x2ec   : > { %v716_v3 = vpop.permute.xlu1 %715  ;;  %v864_v4 = vpop.permute.xlu0 %863 }
 0x2ed   : > { %v734_v5 = vcombine.low %v710_v61, %v716_v3  ;;  %v735_v6 = vcombine.high %v710_v61, %v716_v3  ;;  %v869_v18 = vcombine.low %v705_v48, %v864_v4  ;;  %v870_v19 = vcombine.high %v705_v48, %v864_v4 }
 0x2ef   : > { %v742_v10 = vrot.slane %v734_v5, %v2717_v63  ;;  %v749_v11 = vrot.slane %v735_v6, %v2717_v63  ;;  %v877_v30 = vrot.slane %v869_v18, %v2717_v63  ;;  %v884_v31 = vrot.slane %v870_v19, %v2717_v63 }
 0x2f0   : > { %v861_v12 = vpop.permute.xlu1 %860 }
 0x2f1   : > { %v750_v13 = vcombine.low %v726_v8, %v742_v10  ;;  %v751_v15 = vcombine.high %v726_v8, %v742_v10  ;;  %v766_v16 = vcombine.low %v733_v9, %v749_v11  ;;  %v767_v17 = vcombine.high %v733_v9, %v749_v11 }
 0x2f2   : > { %v1127_v20 = vpop.permute.xlu0 %1126 }
 0x2f3   : > { %v758_v21 = vrot.slane %v750_v13, %v2719_v7  ;;  %v765_v22 = vrot.slane %v751_v15, %v2719_v7  ;;  %v774_v23 = vrot.slane %v766_v16, %v2719_v7  ;;  %v781_v24 = vrot.slane %v767_v17, %v2719_v7 }
 0x2f4   : > { %v867_v25 = vpop.permute.xlu1 %866 }
 0x2f5   : > { %v786_v26 = vcombine.low %v758_v21, %v765_v22  ;;  %v1888_v27 = vcombine.high %v758_v21, %v765_v22  ;;  %v802_v28 = vcombine.low %v774_v23, %v781_v24  ;;  %v1889_v29 = vcombine.high %v774_v23, %v781_v24 }
 0x2f6   : > { %v885_v32 = vcombine.low %v861_v12, %v867_v25  ;;  %v886_v33 = vcombine.high %v861_v12, %v867_v25  ;;  %v1133_v34 = vpop.permute.xlu0 %1132 }
 0x2f7   : > { %v793_v35 = vrot.slane %v786_v26, %v2717_v63  ;;  %v801_v36 = vrot.slane %v1888_v27, %v2717_v63  ;;  %v809_v37 = vrot.slane %v802_v28, %v2717_v63  ;;  %v817_v38 = vrot.slane %v1889_v29, %v2717_v63 }
 0x2f8   : > { %v893_v39 = vrot.slane %v885_v32, %v2717_v63  ;;  %v900_v40 = vrot.slane %v886_v33, %v2717_v63  ;;  %v1151_v41 = vcombine.low %v1127_v20, %v1133_v34  ;;  %v1152_v42 = vcombine.high %v1127_v20, %v1133_v34  ;;  %v1130_v60 = vpop.permute.xlu1 %1129 }
 0x2f9   : > { %v818_v43 = vcombine.low %v793_v35, %v801_v36  ;;  %v819_v44 = vcombine.high %v793_v35, %v801_v36  ;;  %v834_v45 = vcombine.low %v809_v37, %v817_v38  ;;  %v835_v46 = vcombine.high %v809_v37, %v817_v38 }
 0x2fa   : > { %v901_v47 = vcombine.low %v877_v30, %v893_v39  ;;  %v902_v48 = vcombine.high %v877_v30, %v893_v39  ;;  %v917_v49 = vcombine.low %v884_v31, %v900_v40  ;;  %v918_v50 = vcombine.high %v884_v31, %v900_v40 }
 0x2fb   : > { %v826_v52 = vrot.slane %v818_v43, %v2719_v7  ;;  %v833_v53 = vrot.slane %v819_v44, %v2719_v7  ;;  %v842_v54 = vrot.slane %v834_v45, %v2719_v7  ;;  %v849_v55 = vrot.slane %v835_v46, %v2719_v7 }
 0x2fc   : > { %v909_v56 = vrot.slane %v901_v47, %v2719_v7  ;;  %v916_v57 = vrot.slane %v902_v48, %v2719_v7  ;;  %v925_v58 = vrot.slane %v917_v49, %v2719_v7  ;;  %v932_v59 = vrot.slane %v918_v50, %v2719_v7 }
 0x2fd   : > { %v850_v61 = vcombine.low %v826_v52, %v842_v54  ;;  %v851_v62 = vcombine.high %v826_v52, %v842_v54  ;;  %v852_v0 = vcombine.low %v833_v53, %v849_v55  ;;  %v853_v2 = vcombine.high %v833_v53, %v849_v55 }
 0x2fe   : > { %v937_v3 = vcombine.low %v909_v56, %v916_v57  ;;  %v1890_v4 = vcombine.high %v909_v56, %v916_v57  ;;  %v953_v5 = vcombine.low %v925_v58, %v932_v59  ;;  %v1891_v6 = vcombine.high %v925_v58, %v932_v59 }
 0x2ff   : > { %855 = vst.msk [vmem:[#allocation2] sm:$0xff] %vm854_vm2, %v850_v61  ;;  %856 = vst.msk [vmem:[#allocation2 + $0x8] sm:$0xff] %vm854_vm2, %v851_v62  ;;  %v1135_v8 = vcombine.low %v2712_v51, %v1130_v60  ;;  %v1136_v9 = vcombine.high %v2712_v51, %v1130_v60  ;;  %v1159_v15 = vrot.slane %v1151_v41, %v2717_v63 }
 0x300   : > { %857 = vst.msk [vmem:[#allocation2 + $0x10] sm:$0xff] %vm854_vm2, %v852_v0  ;;  %858 = vst.msk [vmem:[#allocation2 + $0x18] sm:$0xff] %vm854_vm2, %v853_v2  ;;  %v944_v10 = vrot.slane %v937_v3, %v2717_v63  ;;  %v952_v11 = vrot.slane %v1890_v4, %v2717_v63  ;;  %v960_v12 = vrot.slane %v953_v5, %v2717_v63 }
 0x301   : > { %v968_v13 = vrot.slane %v1891_v6, %v2717_v63  ;;  %v1166_v16 = vrot.slane %v1152_v42, %v2717_v63  ;;  %v1143_v17 = vrot.slane %v1135_v8, %v2717_v63  ;;  %v1150_v18 = vrot.slane %v1136_v9, %v2717_v63 }
 0x302   : > { %v969_v19 = vcombine.low %v944_v10, %v952_v11  ;;  %v970_v20 = vcombine.high %v944_v10, %v952_v11 }
 0x303   : > { %v985_v21 = vcombine.low %v960_v12, %v968_v13  ;;  %v986_v51 = vcombine.high %v960_v12, %v968_v13  ;;  %v1167_v22 = vcombine.low %v1143_v17, %v1159_v15  ;;  %v1168_v23 = vcombine.high %v1143_v17, %v1159_v15 }
 0x304   : > { %v1183_v24 = vcombine.low %v1150_v18, %v1166_v16  ;;  %v1184_v25 = vcombine.high %v1150_v18, %v1166_v16  ;;  %v977_v26 = vrot.slane %v969_v19, %v2719_v7  ;;  %v984_v27 = vrot.slane %v970_v20, %v2719_v7 }
 0x305   : > { %v993_v28 = vrot.slane %v985_v21, %v2719_v7  ;;  %v1000_v29 = vrot.slane %v986_v51, %v2719_v7  ;;  %v1175_v30 = vrot.slane %v1167_v22, %v2719_v7  ;;  %v1182_v31 = vrot.slane %v1168_v23, %v2719_v7 }
 0x306   : > { %v1191_v32 = vrot.slane %v1183_v24, %v2719_v7  ;;  %v1198_v33 = vrot.slane %v1184_v25, %v2719_v7 }
 0x307   : > { %v1001_v34 = vcombine.low %v977_v26, %v993_v28  ;;  %v1002_v35 = vcombine.high %v977_v26, %v993_v28  ;;  %v1003_v36 = vcombine.low %v984_v27, %v1000_v29  ;;  %v1004_v37 = vcombine.high %v984_v27, %v1000_v29 }
 0x308   : > { %v1203_v38 = vcombine.low %v1175_v30, %v1182_v31  ;;  %v1896_v39 = vcombine.high %v1175_v30, %v1182_v31  ;;  %v1219_v40 = vcombine.low %v1191_v32, %v1198_v33  ;;  %v1897_v41 = vcombine.high %v1191_v32, %v1198_v33 }
 0x309   : > { %1005 = vst.msk [vmem:[#allocation3] sm:$0xff] %vm854_vm2, %v1001_v34  ;;  %1006 = vst.msk [vmem:[#allocation3 + $0x8] sm:$0xff] %vm854_vm2, %v1002_v35 }
 0x30a   : > { %1007 = vst.msk [vmem:[#allocation3 + $0x10] sm:$0xff] %vm854_vm2, %v1003_v36  ;;  %1008 = vst.msk [vmem:[#allocation3 + $0x18] sm:$0xff] %vm854_vm2, %v1004_v37  ;;  %v1210_v42 = vrot.slane %v1203_v38, %v2717_v63  ;;  %v1218_v43 = vrot.slane %v1896_v39, %v2717_v63  ;;  %v1226_v44 = vrot.slane %v1219_v40, %v2717_v63 }
 0x30b   : > { %v1234_v45 = vrot.slane %v1897_v41, %v2717_v63 }
 0x30c   : > { %v1235_v46 = vcombine.low %v1210_v42, %v1218_v43  ;;  %v1236_v47 = vcombine.high %v1210_v42, %v1218_v43 }
 0x30d   : > { %v1251_v48 = vcombine.low %v1226_v44, %v1234_v45  ;;  %v1252_v49 = vcombine.high %v1226_v44, %v1234_v45 }
 0x30e   : > { %v1243_v50 = vrot.slane %v1235_v46, %v2719_v7  ;;  %v1250_v52 = vrot.slane %v1236_v47, %v2719_v7 }
 0x30f   : > { %v1259_v53 = vrot.slane %v1251_v48, %v2719_v7  ;;  %v1266_v54 = vrot.slane %v1252_v49, %v2719_v7 }
 0x311   : > { %v1267_v55 = vcombine.low %v1243_v50, %v1259_v53  ;;  %v1268_v56 = vcombine.high %v1243_v50, %v1259_v53  ;;  %v1269_v57 = vcombine.low %v1250_v52, %v1266_v54  ;;  %v1270_v58 = vcombine.high %v1250_v52, %v1266_v54 }
 0x313   : > { %1272 = vst.msk [vmem:[#allocation4] sm:$0xff] %vm854_vm2, %v1267_v55  ;;  %1273 = vst.msk [vmem:[#allocation4 + $0x8] sm:$0xff] %vm854_vm2, %v1268_v56 }
 0x314   : > { %1274 = vst.msk [vmem:[#allocation4 + $0x10] sm:$0xff] %vm854_vm2, %v1269_v57  ;;  %1275 = vst.msk [vmem:[#allocation4 + $0x18] sm:$0xff] %vm854_vm2, %v1270_v58 }
 0x315 LB: >> { %v2413_v59 = vmov 0.0   ;;  %vm2414_vm3 = vmmov 0   ;;  %s2790_s17 = sshll.u32 %s2396_s26, 3  ;;  %s1281_s26 = sadd.s32 1, %s2396_s26   ;;  %s2396_s26 = sphi %s2784_s26, %s1281_s26  }
 0x316   : >> { %1967 = vmatprep.subr.mxu0 %v2413_v59  ;;  %1969 = vmatprep.mubr.msk.f32.mxu0 %vm2414_vm3, %v2413_v59  ;;  %s1285_s24 = scalar_lea.vmem [#allocation2], %s2790_s17  ;;  %s1283_s28 = scalar_lea.vmem [#allocation4], %s2790_s17 }
 0x317   : >> { %1972 = vmatprep.subr.mxu1 %v2413_v59  ;;  %1974 = vmatprep.mubr.msk.f32.mxu1 %vm2414_vm3, %v2413_v59  ;;  %v1286_v60 = vld [vmem:[%s1285_s24] sm:$0xff]  ;;  %s1374_s23 = scalar_lea.vmem [#allocation3], %s2790_s17  ;;  %s1449_s15 = scalar_lea.vmem [#allocation5], %s2790_s17 }
 0x318   : >> { %1968 = vmatpush3.xpose.msk.msra.mxu0 %vm854_vm2, %v1286_v60  ;;  %v1375_v9 = vld [vmem:[%s1374_s23] sm:$0xff]  ;;  %p1278_p0 = scmp.ge.s32.totalorder %s1281_s26, 4  }
 0x319   : >> { %1973 = vmatpush3.msra.mxu1 %v1375_v9  ;;  %1977 = vmatprep.subr.mxu0 (%p1278_p0), %v2406_v14  ;;  %v1611_v20 = vld [vmem:[#allocation15 + $0x18] sm:$0xff] (%p1278_p0)  ;;  %v1610_v28 = vld [vmem:[#allocation15 + $0x10] sm:$0xff] (%p1278_p0)  ;;  %v1609_v29 = vld [vmem:[#allocation15 + $0x8] sm:$0xff] (%p1278_p0)  ;;  %s2415_s14 = smov (%p1278_p0), 8   ;;  %s2416_s25 = smov (%p1278_p0), 24   ;;  %vm1604_vm4 = vcmask (%p1278_p0), 130048  }
 0x31a   : > { %v1608_v38 = vld [vmem:[#allocation15] sm:$0xff] (%p1278_p0)  ;;  %s2417_s12 = smov (%p1278_p0), 16   ;;  %vm1606_vm5 = vcmask (%p1278_p0), 195584   ;;  %s1907_s16 = sshll.u32 (%p1278_p0), %s2384_s20, 7 }
 0x31b   : >> { %v1284_v61 = vld [vmem:[%s1283_s28] sm:$0xff]  ;;  %s1709_s4 = sshll.u32 (%p1278_p0), %s513_s0, 4  ;;  %s1707_s26 = scalar_lea.hbm (%p1278_p0), %s2889_s11, %s1907_s16  ;;  %s1710_s4 = int_to_ptr.vmem [resolvable:$true] %s1709_s4 }
 0x31c   : >> { %1970 = vmatmul.mubr.msk.f32.vlgmr.msra.gmra.mxu0 %vm854_vm2, %v1284_v61  ;;  %v1904_v59 = vld [vmem:[%s2888_s10] ss:$0 sm:$0xff] (%p1278_p0)  ;;  %s1695_s17 = scalar_lea.sflag (%p1278_p0), [#allocation8], %s2642_s7  ;;  %s2292_s24 = scalar_lea.vmem (%p1278_p0), %s1710_s4, 128 }
 0x31d   : > { %1985 = vmatprep.mubr.msk.f32.mxu0 (%p1278_p0), %vm2407_vm1, %v2406_v14  ;;  %1978 = vmatpush3.msra.mxu0 (%p1278_p0), %v1611_v20  ;;  %p2293_p6 = scmp.ne.s32.totalorder (%p1278_p0), %s1710_s4, %s2292_s24  ;;  %s2418_s20 = smov (%p1278_p0), [#allocation17]  }
 0x31e   : > { %1979 = vmatprep.subr.mxu0 (%p1278_p0), %v2406_v14  ;;  %s2296_s28 = sshll.u32 (%p1278_p0), %s2418_s20, 4  ;;  %s2297_s28 = int_to_ptr.vmem [resolvable:$false] %s2296_s28 }
 0x31f   : > { %1980 = vmatpush3.msra.mxu0 (%p1278_p0), %v1610_v28  ;;  %p2294_p5 = pnand (%p1278_p0), %p2293_p6, %p2597_p2  ;;  %s2298_s23 = scalar_lea.vmem (%p1278_p0), %s2297_s28, 256 }
 0x320   : > { %1981 = vmatprep.subr.mxu0 (%p1278_p0), %v2406_v14  ;;  %p2299_p13 = scmp.lt.s32.totalorder (%p1278_p0), %s1710_s4, %s2297_s28  ;;  %p2300_p4 = scmp.lt.s32.totalorder (%p1278_p0), %s2298_s23, %s2292_s24 }
 0x321   : > { %1982 = vmatpush3.msra.mxu0 (%p1278_p0), %v1609_v29  ;;  %p2295_p11 = pneg (%p1278_p0), %p2294_p5 }
 0x322   : > { %1983 = vmatprep.subr.mxu0 (%p1278_p0), %v2406_v14  ;;  %p2301_p1 = por (%p1278_p0), %p2300_p4, %p2299_p13 }
 0x323   : > { %1984 = vmatpush3.msra.mxu0 (%p1278_p0), %v1608_v38 }
 0x324   : > { %p2302_p3 = pnand (%p1278_p0), %p2301_p1, %p2295_p11 }
 0x3dc   : >> { %v1359_v62 = vpop.f32.mrf.mxu0 }
 0x3dd   : >> { %v1363_v0 = vsel %vm854_vm2, %v1359_v62, -inf }
 0x3de   : >> { %1364 = vmax.xlane.f32.xlu0 %v1363_v0  ;;  %v1971_v2 = vpop.f32.mrf.mxu0 }
 0x467   : >> { %v1365_v3 = vpop.xlane.xlu0 %1364 }
 0x468   : >> { %v1366_v4 = vsub.f32 %v1359_v62, %v1365_v3 }
 0x46a   : >> { %v1367_v5 = vmul.f32 1.442695, %v1366_v4 }
 0x46c   : >> { %2122 = vpow2.f32 %v1367_v5 }
 0x479   : >> { %v2123_v6 = vpop.eup %2122 }
 0x47a   : >> { %v1369_v8 = vsel %vm854_vm2, %v2123_v6, 0.0 }
 0x47b   : >> { %1370 = vadd.xlane.f32.xlu0 %v1369_v8 }
 0x504   : >> { %v1371_v10 = vpop.xlane.xlu0 %1370 }
 0x505   : >> { %2124 = vrcp.f32 %v1371_v10 }
 0x512   : >> { %v2125_v11 = vpop.eup %2124 }
 0x513   : >> { %v1373_v12 = vmul.f32 %v2125_v11, %v2123_v6 }
 0x515   : >> { %1975 = vmatmul.mubr.msk.f32.vlgmr.msra.gmra.mxu1 %vm854_vm2, %v1373_v12 }
 0x5d3   : > { %1280 = sbr.rel (!%p1278_p0) target bundleno = 789 (0x315), region = 153 }
 0x5d5   : >> { %v1445_v13 = vpop.f32.mrf.mxu1 }
 0x5d6   : >> { %1450 = vst.msk [vmem:[%s1449_s15] sm:$0xff] %vm854_vm2, %v1445_v13 }
 0x5d7   : >> { %v1976_v15 = vpop.f32.mrf.mxu1 }
 0x5dd   : > { %v2126_v16 = vld [vmem:[#allocation5] ss:$16 sps:$4 sm:$0xff]   ;;  %v2128_v17 = vld [vmem:[#allocation5 + $0x4] ss:$16 sps:$4 sm:$0xff]   ;;  %v2129_v18 = vld [vmem:[#allocation5 + $0x8] ss:$16 sps:$4 sm:$0xff]  }
 0x5de   : > { %v2131_v19 = vld [vmem:[#allocation5 + $0xc] ss:$16 sps:$4 sm:$0xff]   ;;  %v1463_v21 = vrot.slane %v2126_v16, %v2717_v63  ;;  %v1470_v51 = vrot.slane %v2128_v17, %v2717_v63  ;;  %v1479_v22 = vrot.slane %v2129_v18, %v2717_v63 }
 0x5df   : > { %v1486_v23 = vrot.slane %v2131_v19, %v2717_v63 }
 0x5e0   : > { %v1487_v24 = vcombine.low %v1463_v21, %v1479_v22  ;;  %v1488_v25 = vcombine.high %v1463_v21, %v1479_v22 }
 0x5e1   : > { %v1503_v26 = vcombine.low %v1470_v51, %v1486_v23  ;;  %v1504_v27 = vcombine.high %v1470_v51, %v1486_v23 }
 0x5e2   : > { %v1495_v30 = vrot.slane %v1487_v24, %v2719_v7  ;;  %v1502_v31 = vrot.slane %v1488_v25, %v2719_v7 }
 0x5e3   : > { %v1511_v32 = vrot.slane %v1503_v26, %v2719_v7  ;;  %v1518_v33 = vrot.slane %v1504_v27, %v2719_v7 }
 0x5e4   : > { %v1523_v34 = vcombine.low %v1495_v30, %v1502_v31  ;;  %v1902_v35 = vcombine.high %v1495_v30, %v1502_v31 }
 0x5e5   : > { %v1539_v36 = vcombine.low %v1511_v32, %v1518_v33  ;;  %v1903_v37 = vcombine.high %v1511_v32, %v1518_v33 }
 0x5e6   : > { %v1530_v39 = vrot.slane %v1523_v34, %v2717_v63  ;;  %v1538_v40 = vrot.slane %v1902_v35, %v2717_v63 }
 0x5e7   : > { %v1546_v41 = vrot.slane %v1539_v36, %v2717_v63  ;;  %v1554_v42 = vrot.slane %v1903_v37, %v2717_v63 }
 0x5e8   : > { %v1555_v43 = vcombine.low %v1530_v39, %v1538_v40  ;;  %v1556_v45 = vcombine.high %v1530_v39, %v1538_v40 }
 0x5e9   : > { %v1571_v44 = vcombine.low %v1546_v41, %v1554_v42  ;;  %v1572_v46 = vcombine.high %v1546_v41, %v1554_v42 }
 0x5ea   : > { %v1563_v47 = vrot.slane %v1555_v43, %v2719_v7  ;;  %v1570_v14 = vrot.slane %v1556_v45, %v2719_v7 }
 0x5eb   : > { %v1579_v48 = vrot.slane %v1571_v44, %v2719_v7  ;;  %v1586_v49 = vrot.slane %v1572_v46, %v2719_v7 }
 0x5ed   : > { %v1588_v50 = vcombine.high %v1563_v47, %v1579_v48  ;;  %v1590_v52 = vcombine.high %v1570_v14, %v1586_v49  ;;  %v1587_v53 = vcombine.low %v1563_v47, %v1579_v48  ;;  %v1589_v54 = vcombine.low %v1570_v14, %v1586_v49 }
 0x5ef   : > { %1592 = vrot.lane.b32.xlu0 %v1588_v50, %s2415_s14  ;;  %1600 = vrot.lane.b32.xlu1 %v1590_v52, %s2416_s25 }
 0x5f3   : > { %1596 = vrot.lane.b32.xlu0 %v1589_v54, %s2417_s12 }
 0x661   : > { %v1593_v63 = vpop.permute.xlu0 %1592  ;;  %v1601_v55 = vpop.permute.xlu1 %1600 }
 0x662   : > { %v1603_v7 = vsel %vm854_vm2, %v1587_v53, %v1593_v63 }
 0x665   : > { %v1597_v56 = vpop.permute.xlu0 %1596 }
 0x666   : > { %v1605_v57 = vsel %vm1604_vm4, %v1603_v7, %v1597_v56 }
 0x667   : > { %v1607_v58 = vsel %vm1606_vm5, %v1605_v57, %v1601_v55 }
 0x668   : > { %1986 = vmatmul.mubr.msk.f32.vlgmr.msra.gmra.mxu0 %vm521_vm0, %v1607_v58 }
 0x728   : > { %v1688_v60 = vpop.f32.mrf.mxu0 }
 0x729   : > { %v1689_v61 = vadd.f32 %v1904_v59, %v1688_v60 }
 0x72a   : > { %v1987_v62 = vpop.f32.mrf.mxu0 }
 0x72b   : > { %v1692_v0 = vadd.f32 %v1689_v61, %v2671_v1 }
 0x72d   : > { %1693 = vst.msk [vmem:[%s513_s0] sm:$0xff] %vm521_vm0, %v1692_v0 }
 0x72e   : > { %2305 = shalt.err (!%p2302_p3)
}
 0x72f   : > { %s2306_s15 = scalar_lea.hbm %s1707_s26, 128  ;;  %s2310_s0 = scalar_lea.hbm %s2889_s11, 256 }
 0x730   : > { %p2307_p9 = scmp.ne.s32.totalorder %s1707_s26, %s2306_s15  ;;  %p2311_p12 = scmp.lt.s32.totalorder %s1707_s26, %s2889_s11 }
 0x731   : > { %p2312_p0 = scmp.lt.s32.totalorder %s2310_s0, %s2306_s15 }
 0x732   : > { %p2308_p10 = pnand %p2307_p9, %p2597_p2 }
 0x733   : > { %p2313_p6 = por %p2312_p0, %p2311_p12 }
 0x734   : > { %p2309_p7 = pneg %p2308_p10 }
 0x736   : > { %p2314_p5 = pnand %p2313_p6, %p2309_p7 }
 0x738   : > { %2317 = shalt.err (!%p2314_p5)
}
 0x739   : > { %2008 = dma.vmem_to_hbm [thread:$0]  (%p2597_p2), %s1710_s4, 128, %s1707_s26, %s1695_s17  }
 0x73a PF: > { %s2921_s12 = sld [smem:[#allocation24_spill]]  ;;  %p2922_p11 = scmp.ge.s32.totalorder %s2392_s22, 2 }
 0x73c   : > { %p2031_p13 = pnand %p2922_p11, %p2604_p8 }
 0x73e   : > { %p2032_p4 = pneg %p2031_p13 }
 0x740   : > { %s1721_s13 = sand.u32 1, %s2921_s12  }
 0x741   : > { %s1722_s27 = scalar_lea.sflag [#allocation8], %s1721_s13 }
 0x742   : > { %2367 = dma.done.wait (%p2032_p4), %s1722_s27, 128  }
 0x743   : > { %2369 = vsyncadd (%p2032_p4), %s1722_s27, 4294967168  ;;  %s32_s22 = sadd.s32 1, %s2392_s22   ;;  %s2923_s16 = sld [smem:[#allocation27_spill]] }
 0x744   : > { %p29_p1 = scmp.ge.s32.totalorder %s32_s22, 4   ;;  %s2924_s20 = sld [smem:[#allocation25_spill]] }
 0x745   : > { %s2925_s21 = sld [smem:[#allocation26_spill]]  ;;  %s2926_s17 = smov %s2376_s18 }
 0x746   : > { %s2927_s18 = smov %s2380_s19  ;;  %31 = sbr.rel (!%p29_p1) target bundleno = 16 (0x10), region = 164 }
 0x749   : > { %s2928_s19 = smov %s2923_s16 }
 0x74b   :  { %1727 = vsyncpa [#allocation7], 1 }
 0x74c   :  { %1729 = vsyncpa [#allocation7 + $0x1], 1 }
 0x74d   :  { %1730 = vsyncpa [#allocation10], 1 }
 0x74e   :  { %1732 = vsyncpa [#allocation10 + $0x1], 1 }
 0x74f   :  { %1733 = vsyncpa [#allocation13], 1 }
 0x750   :  { %1734 = vsyncpa [#allocation16], 1 }
 0x751   :  { %1735 = vsyncpa [#allocation8], 1 }
 0x752   :  { %1737 = vsyncpa [#allocation8 + $0x1], 1 }

</bundles_post_ra>
